<compile_context>
chip_gen: v6e
topology: v6e:2x2x1
jax: 0.10.0
libtpu: 0.0.40
codegen_flags: <defaults>
</compile_context>

<pallas_src>
import functools

import jax
import jax.numpy as jnp
from jax.experimental import pallas as pl
from jax.experimental.pallas import tpu as pltpu


def _round_up(v, m):
    return ((v + m - 1) // m) * m


def _vmem_budget_bytes():
    """Physical VMEM per TensorCore minus headroom for compiler scratch."""
    cap = 64 * 1024 * 1024  # conservative default (v7x per-TC VMEM)
    try:
        cap = int(pltpu.get_tpu_info().vmem_capacity_bytes)
    except Exception:
        pass
    return max(cap - 8 * 1024 * 1024, 32 * 1024 * 1024)


def _default_act_dtype(compute_dtype):
    """bf16 GELU on v6e/v7x (bf16 VPU/EUP); keep f32 activations on v5."""
    try:
        kind = jax.devices()[0].device_kind.lower()
        if "v5" in kind:
            return jnp.float32
    except Exception:
        pass
    return compute_dtype


# --------------------------------------------------------------------------
# Kernels
# --------------------------------------------------------------------------
def _boom_resident_kernel(x_ref, w1_ref, b1_ref, w2_ref, b2_ref, o_ref, *,
                          act_dtype):
    # x_ref:  (tm, d_model)        input rows (compute dtype)
    # w1_ref: (d_model, dim_ff)    full W1 (VMEM-resident across M tiles)
    # b1_ref: (1, dim_ff)          bias (f32)
    # w2_ref: (dim_ff, d_model)    full W2 (VMEM-resident)
    # b2_ref: (1, d_model)         output bias (f32)
    # o_ref:  (tm, d_model)        output tile
    h = jnp.dot(x_ref[...], w1_ref[...], preferred_element_type=jnp.float32)
    h = (h + b1_ref[...]).astype(act_dtype)
    h = h * jax.nn.sigmoid(1.702 * h)            # GELU approx used by the module
    z = jnp.dot(h.astype(w2_ref.dtype), w2_ref[...],
                preferred_element_type=jnp.float32)
    o_ref[...] = (z + b2_ref[...]).astype(o_ref.dtype)


def _boom_slab_kernel(x_ref, w1_ref, b1_ref, w2_ref, b2_ref, o_ref, acc_ref, *,
                      act_dtype):
    # Fallback: dim_ff split into slabs; accumulate partial second matmul.
    j = pl.program_id(1)

    @pl.when(j == 0)
    def _init():
        acc_ref[...] = jnp.zeros_like(acc_ref)

    h = jnp.dot(x_ref[...], w1_ref[...], preferred_element_type=jnp.float32)
    h = (h + b1_ref[...]).astype(act_dtype)
    h = h * jax.nn.sigmoid(1.702 * h)
    acc_ref[...] += jnp.dot(h.astype(w2_ref.dtype), w2_ref[...],
                            preferred_element_type=jnp.float32)

    @pl.when(j == pl.num_programs(1) - 1)
    def _finalize():
        o_ref[...] = (acc_ref[...] + b2_ref[...]).astype(o_ref.dtype)


# --------------------------------------------------------------------------
# Wrapper
# --------------------------------------------------------------------------
def boom_forward(x, w1, b1, w2, b2, *, tm=512, tf=1024,
                 compute_dtype=jnp.bfloat16, act_dtype=None):
    """x: (..., d_model) -> (..., d_model).  Fused Boom forward (eval mode)."""
    orig_shape = x.shape
    d_model = orig_shape[-1]
    dim_ff = w1.shape[1]
    out_dtype = x.dtype
    if act_dtype is None:
        act_dtype = _default_act_dtype(compute_dtype)

    x2d = x.reshape(-1, d_model)
    M = x2d.shape[0]

    csz = jnp.dtype(compute_dtype).itemsize
    osz = jnp.dtype(out_dtype).itemsize
    asz = jnp.dtype(act_dtype).itemsize
    sub = max(8, 32 // csz)  # sublane packing multiple (16 for bf16, 8 for f32)

    # Cast matmul operands to the MXU compute dtype only when needed; callers
    # should pre-cast weights once so these are no-ops on the hot path.
    xc = x2d if x2d.dtype == compute_dtype else x2d.astype(compute_dtype)
    w1c = w1 if w1.dtype == compute_dtype else w1.astype(compute_dtype)
    w2c = w2 if w2.dtype == compute_dtype else w2.astype(compute_dtype)
    b1f = b1.astype(jnp.float32).reshape(1, dim_ff)
    b2f = b2.astype(jnp.float32).reshape(1, d_model)

    vmem_budget = _vmem_budget_bytes()

    # ---- path selection & tile sizing -------------------------------------
    w_bytes = 2 * d_model * dim_ff * csz + (dim_ff + d_model) * 4

    def resident_footprint(t_m):
        return (2 * w_bytes                               # weights (2 buffers)
                + 2 * t_m * d_model * (csz + osz)         # x / out tiles (dbl-buf)
                + t_m * dim_ff * (4 + asz)                # h intermediates
                + t_m * d_model * 4)                      # z (f32)

    def slab_footprint(t_m, t_f):
        return (2 * (t_m * d_model * csz + d_model * t_f * csz + t_f * 4
                     + t_f * d_model * csz + d_model * 4 + t_m * d_model * osz)
                + t_m * t_f * (4 + asz)                   # h intermediates
                + t_m * d_model * 4)                      # f32 accumulator

    resident = resident_footprint(sub) <= vmem_budget

    tm_eff = _round_up(min(tm, _round_up(M, sub)), sub)
    if resident:
        while resident_footprint(tm_eff) > vmem_budget and tm_eff > sub:
            tm_eff = max(sub, _round_up(tm_eff // 2, sub))
        tf_eff = dim_ff
        F_pad = dim_ff
    else:
        tf_eff = _round_up(min(tf, _round_up(dim_ff, 128)), 128)
        while slab_footprint(tm_eff, tf_eff) > vmem_budget and tf_eff > 128:
            tf_eff = max(128, _round_up(tf_eff // 2, 128))
        while slab_footprint(tm_eff, tf_eff) > vmem_budget and tm_eff > sub:
            tm_eff = max(sub, _round_up(tm_eff // 2, sub))
        F_pad = _round_up(dim_ff, tf_eff)

    # Megacore (v7x): keep >= 2 M tiles when it costs no extra padding so the
    # "parallel" M axis can be split across both TensorCores.
    M_pad = _round_up(M, tm_eff)
    if M_pad // tm_eff < 2:
        half = tm_eff // 2
        if half >= sub and half % sub == 0 and M_pad % half == 0:
            tm_eff = half
    M_pad = _round_up(M, tm_eff)
    n_m = M_pad // tm_eff

    if M_pad != M:
        # Padded rows are sliced off after the call; they contribute nothing.
        xc = jnp.pad(xc, ((0, M_pad - M), (0, 0)))

    # ---- pallas_call -------------------------------------------------------
    if resident:
        kernel = functools.partial(_boom_resident_kernel, act_dtype=act_dtype)
        vmem_limit = int(min(max(int(resident_footprint(tm_eff) * 1.25),
                                 32 * 1024 * 1024), vmem_budget))
        cost = pl.CostEstimate(
            flops=4 * M_pad * d_model * dim_ff,
            transcendentals=M_pad * dim_ff,
            bytes_accessed=(xc.size * csz + w1c.size * csz + w2c.size * csz
                            + b1f.size * 4 + b2f.size * 4
                            + M_pad * d_model * osz),
        )
        out = pl.pallas_call(
            kernel,
            out_shape=jax.ShapeDtypeStruct((M_pad, d_model), out_dtype),
            grid_spec=pltpu.PrefetchScalarGridSpec(
                num_scalar_prefetch=0,
                grid=(n_m,),
                in_specs=[
                    pl.BlockSpec((tm_eff, d_model), lambda i: (i, 0)),   # x rows
                    pl.BlockSpec((d_model, dim_ff), lambda i: (0, 0)),   # W1 resident
                    pl.BlockSpec((1, dim_ff), lambda i: (0, 0)),         # b1 resident
                    pl.BlockSpec((dim_ff, d_model), lambda i: (0, 0)),   # W2 resident
                    pl.BlockSpec((1, d_model), lambda i: (0, 0)),        # b2 resident
                ],
                out_specs=pl.BlockSpec((tm_eff, d_model), lambda i: (i, 0)),
            ),
            compiler_params=pltpu.CompilerParams(
                dimension_semantics=("parallel",),
                vmem_limit_bytes=vmem_limit,
            ),
            cost_estimate=cost,
        )(xc, w1c, b1f, w2c, b2f)
    else:
        # Zero padding of the ff axis is exact: padded columns give GELU(0)=0
        # and their W2 rows are zero, so they contribute nothing.
        if F_pad != dim_ff:
            w1c = jnp.pad(w1c, ((0, 0), (0, F_pad - dim_ff)))
            b1f = jnp.pad(b1f, ((0, 0), (0, F_pad - dim_ff)))
            w2c = jnp.pad(w2c, ((0, F_pad - dim_ff), (0, 0)))
        n_f = F_pad // tf_eff

        kernel = functools.partial(_boom_slab_kernel, act_dtype=act_dtype)
        vmem_limit = int(min(max(int(slab_footprint(tm_eff, tf_eff) * 1.25),
                                 32 * 1024 * 1024), vmem_budget))
        cost = pl.CostEstimate(
            flops=4 * M_pad * d_model * F_pad,
            transcendentals=M_pad * F_pad,
            bytes_accessed=(xc.size * csz
                            + n_m * (w1c.size * csz + w2c.size * csz
                                     + b1f.size * 4)          # weight re-reads
                            + b2f.size * 4 + M_pad * d_model * osz),
        )
        out = pl.pallas_call(
            kernel,
            out_shape=jax.ShapeDtypeStruct((M_pad, d_model), out_dtype),
            grid_spec=pltpu.PrefetchScalarGridSpec(
                num_scalar_prefetch=0,
                grid=(n_m, n_f),
                in_specs=[
                    pl.BlockSpec((tm_eff, d_model), lambda i, j: (i, 0)),  # x rows
                    pl.BlockSpec((d_model, tf_eff), lambda i, j: (0, j)),  # W1 slab
                    pl.BlockSpec((1, tf_eff), lambda i, j: (0, j)),        # b1 slab
                    pl.BlockSpec((tf_eff, d_model), lambda i, j: (j, 0)),  # W2 slab
                    pl.BlockSpec((1, d_model), lambda i, j: (0, 0)),       # b2
                ],
                out_specs=pl.BlockSpec((tm_eff, d_model), lambda i, j: (i, 0)),
                scratch_shapes=[pltpu.VMEM((tm_eff, d_model), jnp.float32)],
            ),
            compiler_params=pltpu.CompilerParams(
                dimension_semantics=("parallel", "arbitrary"),
                vmem_limit_bytes=vmem_limit,
            ),
            cost_estimate=cost,
        )(xc, w1c, b1f, w2c, b2f)

    if M_pad != M:
        out = out[:M]
    return out.reshape(orig_shape)


def make_params(key, d_model, dim_ff, dtype=jnp.float32):
    """Deterministic synthetic parameters matching nn.Linear shapes.

    PyTorch nn.Linear stores weight as (out, in); we store the transposed
    (in, out) layout so the kernel computes x @ W directly.
    """
    k1, k2, k3, k4 = jax.random.split(key, 4)
    s1 = 1.0 / jnp.sqrt(d_model)
    s2 = 1.0 / jnp.sqrt(dim_ff)
    w1 = jax.random.uniform(k1, (d_model, dim_ff), dtype, -s1, s1)
    b1 = jax.random.uniform(k2, (dim_ff,), dtype, -s1, s1)
    w2 = jax.random.uniform(k3, (dim_ff, d_model), dtype, -s2, s2)
    b2 = jax.random.uniform(k4, (d_model,), dtype, -s2, s2)
    return w1, b1, w2, b2


if __name__ == "__main__":
    seq, batch, d_model, dim_ff = 8, 2, 32, 128

    key = jax.random.PRNGKey(0)
    kx, kp = jax.random.split(key)
    x = jax.random.normal(kx, (seq, batch, d_model), jnp.float32)
    w1, b1, w2, b2 = make_params(kp, d_model, dim_ff)

    # Pre-cast weights to the MXU compute dtype once (avoids per-call casts).
    w1c = w1.astype(jnp.bfloat16)
    w2c = w2.astype(jnp.bfloat16)

    z = boom_forward(x, w1c, b1, w2c, b2)
    jax.block_until_ready(z)
    assert z.shape == (seq, batch, d_model)

    # Reference matching the kernel's compute dtype (bf16 operands, f32 accum).
    def bf(v):
        return v.astype(jnp.bfloat16).astype(jnp.float32)

    x2d = x.reshape(-1, d_model)
    h_ref = bf(x2d) @ bf(w1) + b1
    h_ref = h_ref * jax.nn.sigmoid(1.702 * h_ref)
    z_ref = (bf(h_ref) @ bf(w2) + b2).reshape(x.shape)
    assert jnp.allclose(z.astype(jnp.float32), z_ref, atol=2e-2, rtol=2e-2)

    # Loose sanity check against the exact f32 forward pass.
    h32 = x2d @ w1 + b1
    h32 = h32 * jax.nn.sigmoid(1.702 * h32)
    z32 = (h32 @ w2 + b2).reshape(x.shape)
    assert jnp.allclose(z.astype(jnp.float32), z32, atol=6e-2, rtol=6e-2)

    print("KERNEL_OK")
</pallas_src>

<mosaic_0001>
module attributes {stable_mosaic.version = 11 : i64} {
  func.func @_boom_resident_kernel(%arg0: i32, %arg1: memref<16x32xbf16, #tpu.memory_space<vmem>>, %arg2: memref<32x128xbf16, #tpu.memory_space<vmem>>, %arg3: memref<1x128xf32, #tpu.memory_space<vmem>>, %arg4: memref<128x32xbf16, #tpu.memory_space<vmem>>, %arg5: memref<1x32xf32, #tpu.memory_space<vmem>>, %arg6: memref<16x32xf32, #tpu.memory_space<vmem>>) attributes {dimension_semantics = [#tpu.dimension_semantics<parallel>], iteration_bounds = array<i64: 1>, scalar_prefetch = 0 : i64, scratch_operands = 0 : i64, tpu.core_type = #tpu.core_type<tc>, window_params = [{transform_indices = @transform_0, window_bounds = array<i64: 16, 32>}, {pipeline_mode = #tpu.pipeline_mode<synchronous>, transform_indices = @transform_1, window_bounds = array<i64: 32, 128>}, {pipeline_mode = #tpu.pipeline_mode<synchronous>, transform_indices = @transform_2, window_bounds = array<i64: 1, 128>}, {pipeline_mode = #tpu.pipeline_mode<synchronous>, transform_indices = @transform_3, window_bounds = array<i64: 128, 32>}, {pipeline_mode = #tpu.pipeline_mode<synchronous>, transform_indices = @transform_4, window_bounds = array<i64: 1, 32>}, {transform_indices = @transform_5, window_bounds = array<i64: 16, 32>}]} {
    %c0 = arith.constant 0 : index
    %c0_0 = arith.constant 0 : index
    %0 = vector.load %arg1[%c0, %c0_0] : memref<16x32xbf16, #tpu.memory_space<vmem>>, vector<16x32xbf16>
    %c0_1 = arith.constant 0 : index
    %c0_2 = arith.constant 0 : index
    %1 = vector.load %arg2[%c0_1, %c0_2] : memref<32x128xbf16, #tpu.memory_space<vmem>>, vector<32x128xbf16>
    %cst = arith.constant dense<0.000000e+00> : vector<16x128xf32>
    %2 = tpu.matmul %0, %1, %cst {dimension_numbers = #tpu.dot_dimension_numbers<[1], [0], [0], [1], [0, 0, 1, 1], [], []>} : vector<16x32xbf16>, vector<32x128xbf16>, vector<16x128xf32> -> vector<16x128xf32>
    %c0_3 = arith.constant 0 : index
    %c0_4 = arith.constant 0 : index
    %3 = vector.load %arg3[%c0_3, %c0_4] : memref<1x128xf32, #tpu.memory_space<vmem>>, vector<1x128xf32>
    %4 = vector.broadcast %3 : vector<1x128xf32> to vector<16x128xf32>
    %5 = arith.addf %2, %4 : vector<16x128xf32>
    %6 = arith.truncf %5 : vector<16x128xf32> to vector<16x128xbf16>
    %cst_5 = arith.constant 1.703130e+00 : bf16
    %7 = vector.broadcast %cst_5 : bf16 to vector<16x128xbf16>
    %8 = arith.mulf %7, %6 : vector<16x128xbf16>
    %9 = arith.negf %8 : vector<16x128xbf16>
    %10 = math.exp %9 : vector<16x128xbf16>
    %cst_6 = arith.constant 1.000000e+00 : bf16
    %11 = vector.broadcast %cst_6 : bf16 to vector<16x128xbf16>
    %12 = arith.addf %11, %10 : vector<16x128xbf16>
    %13 = arith.divf %11, %12 : vector<16x128xbf16>
    %14 = arith.mulf %6, %13 : vector<16x128xbf16>
    %c0_7 = arith.constant 0 : index
    %c0_8 = arith.constant 0 : index
    %15 = vector.load %arg4[%c0_7, %c0_8] : memref<128x32xbf16, #tpu.memory_space<vmem>>, vector<128x32xbf16>
    %cst_9 = arith.constant dense<0.000000e+00> : vector<16x32xf32>
    %16 = tpu.matmul %14, %15, %cst_9 {dimension_numbers = #tpu.dot_dimension_numbers<[1], [0], [0], [1], [0, 0, 1, 1], [], []>} : vector<16x128xbf16>, vector<128x32xbf16>, vector<16x32xf32> -> vector<16x32xf32>
    %c0_10 = arith.constant 0 : index
    %c0_11 = arith.constant 0 : index
    %17 = vector.load %arg5[%c0_10, %c0_11] : memref<1x32xf32, #tpu.memory_space<vmem>>, vector<1x32xf32>
    %18 = vector.broadcast %17 : vector<1x32xf32> to vector<16x32xf32>
    %19 = arith.addf %16, %18 : vector<16x32xf32>
    %c0_12 = arith.constant 0 : index
    %c0_13 = arith.constant 0 : index
    %20 = vector.load %arg6[%c0_12, %c0_13] : memref<16x32xf32, #tpu.memory_space<vmem>>, vector<16x32xf32>
    tpu.vector_store %arg6[%c0_12, %c0_13], %19 {strides = array<i32>} : memref<16x32xf32, #tpu.memory_space<vmem>>, vector<16x32xf32>,
    return
  }
  func.func @transform_0(%arg0: i32) -> (i32, i32) {
    %c0_i32 = arith.constant 0 : i32
    %c0_i32_0 = arith.constant 0 : i32
    return %arg0, %c0_i32 : i32, i32
  }
  func.func @transform_1(%arg0: i32) -> (i32, i32) {
    %c0_i32 = arith.constant 0 : i32
    %c0_i32_0 = arith.constant 0 : i32
    %c0_i32_1 = arith.constant 0 : i32
    return %c0_i32, %c0_i32_0 : i32, i32
  }
  func.func @transform_2(%arg0: i32) -> (i32, i32) {
    %c0_i32 = arith.constant 0 : i32
    %c0_i32_0 = arith.constant 0 : i32
    %c0_i32_1 = arith.constant 0 : i32
    return %c0_i32, %c0_i32_0 : i32, i32
  }
  func.func @transform_3(%arg0: i32) -> (i32, i32) {
    %c0_i32 = arith.constant 0 : i32
    %c0_i32_0 = arith.constant 0 : i32
    %c0_i32_1 = arith.constant 0 : i32
    return %c0_i32, %c0_i32_0 : i32, i32
  }
  func.func @transform_4(%arg0: i32) -> (i32, i32) {
    %c0_i32 = arith.constant 0 : i32
    %c0_i32_0 = arith.constant 0 : i32
    %c0_i32_1 = arith.constant 0 : i32
    return %c0_i32, %c0_i32_0 : i32, i32
  }
  func.func @transform_5(%arg0: i32) -> (i32, i32) {
    %c0_i32 = arith.constant 0 : i32
    %c0_i32_0 = arith.constant 0 : i32
    return %arg0, %c0_i32 : i32, i32
  }
}

</mosaic_0001>

<bundles_post_ra>
// kernel: tpu_custom_call.1
= control target key start
LH: loop header
LB: loop body
LE: loop exit
PB: predicated region body
PF: predicated region fallthrough
CT: control target
= control target key end

     0   :  { %v336_v1 = vmov 0.0   ;;  %vm337_vm0 = vmmov 0   ;;  %vm54_vm1 = vcmask 261120   ;;  %s416_s0 = inlined_call_operand.vmem [shape: bf16[16,32], index: 0, kind: input, shape index: {}]   ;;  %s417_s1 = inlined_call_operand.vmem [shape: bf16[32,128], index: 1, kind: input, shape index: {}]   ;;  %s418_s2 = inlined_call_operand.vmem [shape: f32[1,128], index: 2, kind: input, shape index: {}]   ;;  %s419_s3 = inlined_call_operand.vmem [shape: bf16[128,32], index: 3, kind: input, shape index: {}]   ;;  %s420_s4 = inlined_call_operand.vmem [shape: f32[1,32], index: 4, kind: input, shape index: {}]   ;;  %s421_s5 = inlined_call_operand.hbm [shape: f32[16,32], index: 5, kind: output, shape index: {}]  }
   0x1   :  { %v299_v0 = vld [vmem:[%s417_s1 + $0x8] sm:$0xff]   ;;  %266 = vmatprep.subr.bf16.mxu0 %v336_v1  ;;  %274 = vmatprep.subr.bf16.mxu1 %v336_v1  ;;  %v300_v2 = vld [vmem:[%s417_s1] sm:$0xff]  }
   0x2   :  { %267 = vmatpush3.bf16.msra.mxu0 %v299_v0  ;;  %270 = vmatprep.mubr.msk.bf16.mxu0 %vm337_vm0, %v336_v1  ;;  %v301_v3 = vld [vmem:[%s416_s0] sm:$0xff]  }
   0x3   :  { %268 = vmatprep.subr.bf16.mxu0 %v336_v1  ;;  %290 = vmatprep.mubr.msk.bf16.mxu1 %vm337_vm0, %v336_v1 }
   0x6   :  { %269 = vmatpush3.bf16.msra.mxu0 %v300_v2 }
   0x7   :  { %10 = vsyncpa [#allocation3], 0  ;;  %v302_v4 = vld [vmem:[%s419_s3 + $0x38] sm:$0xff]   ;;  %v303_v5 = vld [vmem:[%s419_s3 + $0x30] sm:$0xff]  }
   0x8   :  { %275 = vmatpush3.bf16.msra.mxu1 %v302_v4  ;;  %v304_v6 = vld [vmem:[%s419_s3 + $0x28] sm:$0xff]   ;;  %v305_v7 = vld [vmem:[%s419_s3 + $0x20] sm:$0xff]   ;;  %v306_v8 = vld [vmem:[%s419_s3 + $0x18] sm:$0xff]  }
   0x9   :  { %271 = vmatmul.mubr.msk.bf16.vlgmr.msra.gmra.mxu0 %vm54_vm1, %v301_v3  ;;  %276 = vmatprep.subr.bf16.mxu1 %v336_v1  ;;  %v307_v9 = vld [vmem:[%s419_s3 + $0x10] sm:$0xff]   ;;  %v308_v10 = vld [vmem:[%s419_s3 + $0x8] sm:$0xff]   ;;  %v309_v11 = vld [vmem:[%s419_s3] sm:$0xff]  }
   0xa   :  { %v239_v13 = vld [vmem:[%s418_s2] ss:$0 sm:$0xff]  ;;  %s338_s2 = smov [#allocation2]  }
   0xb   :  { %v245_v27 = vld [vmem:[%s420_s4] ss:$0 sm:$0xff]  ;;  %s228_s16 = sshll.u32 %s338_s2, 4  ;;  %s229_s16 = int_to_ptr.vmem [resolvable:$true] %s228_s16 }
   0xc   :  { %277 = vmatpush3.bf16.msra.mxu1 %v303_v5  ;;  %s314_s17 = scalar_lea.vmem %s229_s16, 256  ;;  %p319_p1 = scmp.lt.s32.totalorder %s229_s16, %s229_s16 }
   0xd   :  { %278 = vmatprep.subr.bf16.mxu1 %v336_v1  ;;  %p315_p0 = scmp.ne.s32.totalorder %s229_s16, %s314_s17  ;;  %p320_p2 = scmp.lt.s32.totalorder %s314_s17, %s314_s17 }
   0xf   :  { %p321_p3 = por %p320_p2, %p319_p1 }
  0x10   :  { %279 = vmatpush3.bf16.msra.mxu1 %v304_v6 }
  0x11   :  { %280 = vmatprep.subr.bf16.mxu1 %v336_v1  ;;  %p322_p4 = pnand %p321_p3, %p315_p0 }
  0x14   :  { %281 = vmatpush3.bf16.msra.mxu1 %v305_v7 }
  0x15   :  { %282 = vmatprep.subr.bf16.mxu1 %v336_v1 }
  0x18   :  { %283 = vmatpush3.bf16.msra.mxu1 %v306_v8 }
  0x19   :  { %284 = vmatprep.subr.bf16.mxu1 %v336_v1 }
  0x1c   :  { %285 = vmatpush3.bf16.msra.mxu1 %v307_v9 }
  0x1d   :  { %286 = vmatprep.subr.bf16.mxu1 %v336_v1 }
  0x20   :  { %287 = vmatpush3.bf16.msra.mxu1 %v308_v10 }
  0x21   :  { %288 = vmatprep.subr.bf16.mxu1 %v336_v1 }
  0x24   :  { %289 = vmatpush3.bf16.msra.mxu1 %v309_v11 }
  0xc9   :  { %v92_v12 = vpop.f32.mrf.mxu0 }
  0xca   :  { %v93_v16 = vadd.f32 %v239_v13, %v92_v12 }
  0xcb   :  { %v272_v14 = vpop.f32.mrf.mxu0 }
  0xcd   :  { %v95_v15 = vpop.f32.mrf.mxu0 }
  0xce   :  { %v96_v17 = vadd.f32 %v239_v13, %v95_v15 }
  0xcf   :  { %v273_v18 = vpop.f32.mrf.mxu0 }
  0xd0   :  { %v99_v19 = vpack.c.bf16 %v96_v17, %v93_v16 }
  0xd2   :  { %v244_v20 = vmul.bf16 3218784218, %v99_v19 }
  0xd4   :  { %v103_v21 = vmul.bf16 1069105081, %v244_v20 }
  0xd6   :  { %310 = vpow.bf16 %v103_v21 }
  0xe4   :  { %v311_v22 = vpop.eup %310 }
  0xe5   :  { %v105_v23 = vadd.bf16 1065369472, %v311_v22 }
  0xe7   :  { %312 = vrcp.bf16 %v105_v23 }
  0xf5   :  { %v313_v24 = vpop.eup %312 }
  0xf6   :  { %v107_v25 = vmul.bf16 1065369472, %v313_v24 }
  0xf8   :  { %v108_v26 = vmul.bf16 %v107_v25, %v99_v19 }
  0xfa   :  { %291 = vmatmul.mubr.bf16.vlgmr.msra.gmra.mxu1 %v108_v26 }
 0x1ba   :  { %v214_v28 = vpop.f32.mrf.mxu1 }
 0x1bb   :  { %v215_v29 = vadd.f32 %v245_v27, %v214_v28 }
 0x1bc   :  { %v292_v30 = vpop.f32.mrf.mxu1 }
 0x1bd   :  { %221 = vst.msk [vmem:[#allocation2] sm:$0xff] %vm54_vm1, %v215_v29 }
 0x1be   :  { %v217_v31 = vpop.f32.mrf.mxu1 }
 0x1bf   :  { %v218_v32 = vadd.f32 %v245_v27, %v217_v31 }
 0x1c0   :  { %v293_v33 = vpop.f32.mrf.mxu1 }
 0x1c1   :  { %222 = vst.msk [vmem:[#allocation2 + $0x8] sm:$0xff] %vm54_vm1, %v218_v32 }
 0x1c2   :  { %325 = shalt.err (!%p322_p4)
}
 0x1c3   :  { %s339_s4 = smov 128   ;;  %s340_s18 = smov 8  }
 0x1c4   :  { %234 = dma.vmem_to_hbm [thread:$0]  %s229_s16, 256, %s421_s5, [#allocation3], %s339_s4, %s339_s4, %s340_s18  }
 0x1c5   :  { %334 = dma.done.wait [#allocation3], 256  }
 0x1c6   :  { %335 = vsyncadd [#allocation3], 4294967040 }
 0x1c7   :  { %238 = vsyncpa [#allocation3], 1 }

</bundles_post_ra>
